<compile_context>
chip_gen: v7x
topology: tpu7x:2x2x1
jax: 0.10.0
libtpu: 0.0.40
codegen_flags: <defaults>
</compile_context>

<pallas_src>
import functools

import jax
import jax.numpy as jnp
from jax.experimental import pallas as pl
from jax.experimental.pallas import tpu as pltpu


def _round_up(n, m):
    return ((n + m - 1) // m) * m


def _choose_tile_b(batch, tile_b):
    """Lane tile size: multiple of 128, no bigger than needed, and (for large
    batches) capped so the grid keeps >= 2 steps for v7x's two TensorCores."""
    batch = max(int(batch), 1)
    tb = _round_up(min(int(tile_b), batch), 128)
    if batch > 2 * 128:
        tb = min(tb, _round_up(-(-batch // 2), 128))
    return max(tb, 128)


def swipe_nn_kernel(x_ref, w1_ref, b1_ref, w2_ref, b2_ref, w3_ref, b3_ref, o_ref):
    # x_ref : (4, TB)   input (f32 or bf16); batch on the lane axis
    # w1_ref: (32, 4)   b1_ref: (32, 1)
    # w2_ref: (32, 32)  b2_ref: (32, 1)
    # w3_ref: (1, 32)   b3_ref: (1, 1) scalar in SMEM
    # o_ref : (1, TB)   f32
    x = x_ref[...].astype(jnp.float32)                                  # (4, TB)

    # Layer 1: Linear(4 -> 32) + ReLU on the MXU (K=4 is shallow but the MXU is idle).
    h1 = jnp.dot(w1_ref[...], x, preferred_element_type=jnp.float32) + b1_ref[...]
    h1 = jnp.maximum(h1, 0.0)                                           # (32, TB)

    # Layer 2: Linear(32 -> 32) + ReLU on the MXU (kept in f32; see v5e note above).
    h2 = jnp.dot(w2_ref[...], h1, preferred_element_type=jnp.float32) + b2_ref[...]
    h2 = jnp.maximum(h2, 0.0)                                           # (32, TB)

    # Layer 3: Linear(32 -> 1) + Sigmoid; (1,32) x (32,TB) dot on the MXU.
    logits = jnp.dot(w3_ref[...], h2, preferred_element_type=jnp.float32) + b3_ref[0, 0]
    o_ref[...] = jax.nn.sigmoid(logits)                                 # (1, TB)


@functools.partial(jax.jit, static_argnames=("tile_b",))
def swipe_nn_forward_t(xt, params, *, tile_b=32768):
    """Feature-major entry point (no wrapper transpose/pad HBM passes).
       xt: (4, B) with features [age1, age2, distance, tag_similarity] on rows.
       Returns (1, B) float32 probabilities."""
    _, B = xt.shape
    tb = _choose_tile_b(B, tile_b)
    const = lambda shape: pl.BlockSpec(shape, lambda i: (0, 0))   # weights stay resident

    return pl.pallas_call(
        swipe_nn_kernel,
        out_shape=jax.ShapeDtypeStruct((1, B), jnp.float32),
        grid=(pl.cdiv(B, tb),),
        in_specs=[
            pl.BlockSpec((4, tb), lambda i: (0, i)),                  # x tile (pipelined)
            const((32, 4)),                                           # w1
            const((32, 1)),                                           # b1
            const((32, 32)),                                          # w2
            const((32, 1)),                                           # b2
            const((1, 32)),                                           # w3 (PyTorch layout)
            pl.BlockSpec(memory_space=pltpu.MemorySpace.SMEM),        # b3 scalar
        ],
        out_specs=pl.BlockSpec((1, tb), lambda i: (0, i)),
        compiler_params=pltpu.CompilerParams(
            dimension_semantics=("parallel",),       # shards batch grid over v7x's 2 TCs
            vmem_limit_bytes=32 * 1024 * 1024,       # fits v5e/v6e/v7x scoped budgets
        ),
    )(
        xt,
        params["w1"].astype(jnp.float32),
        params["b1"].reshape(32, 1).astype(jnp.float32),
        params["w2"].astype(jnp.float32),
        params["b2"].reshape(32, 1).astype(jnp.float32),
        params["w3"].reshape(1, 32).astype(jnp.float32),
        params["b3"].reshape(1, 1).astype(jnp.float32),
    )


def swipe_nn_forward(x, params, *, tile_b=32768, input_dtype=jnp.float32):
    """PyTorch-layout wrapper.  x: (B, 4).  Returns (B, 1) float32 probabilities.
       Pass input_dtype=jnp.bfloat16 to halve the dominant HBM read traffic on
       v6e/v7x (application-level accuracy tradeoff: ~8-bit mantissa on raw features)."""
    xt = x.T
    if input_dtype is not None and xt.dtype != input_dtype:
        xt = xt.astype(input_dtype)
    out = swipe_nn_forward_t(xt, params, tile_b=tile_b)               # (1, B)
    return out.T                                                      # (B, 1)


def init_params(key):
    """Deterministic init matching PyTorch nn.Linear default:
    U(-1/sqrt(fan_in), 1/sqrt(fan_in)); weights kept in PyTorch (out, in) shape."""
    def linear(key, fan_in, fan_out):
        kw, kb = jax.random.split(key)
        bound = 1.0 / jnp.sqrt(float(fan_in))
        w = jax.random.uniform(kw, (fan_out, fan_in), jnp.float32, -bound, bound)
        b = jax.random.uniform(kb, (fan_out,), jnp.float32, -bound, bound)
        return w, b

    k1, k2, k3 = jax.random.split(key, 3)
    w1, b1 = linear(k1, 4, 32)
    w2, b2 = linear(k2, 32, 32)
    w3, b3 = linear(k3, 32, 1)
    return {"w1": w1, "b1": b1, "w2": w2, "b2": b2, "w3": w3, "b3": b3}


def reference_forward(x, p):
    h1 = jnp.maximum(x @ p["w1"].T + p["b1"], 0.0)
    h2 = jnp.maximum(h1 @ p["w2"].T + p["b2"], 0.0)
    return jax.nn.sigmoid(h2 @ p["w3"].T + p["b3"])


if __name__ == "__main__":
    key = jax.random.PRNGKey(0)
    k_params, k_x = jax.random.split(key)
    params = init_params(k_params)

    # Example inputs: [user1.age, user2.age, distance, tag_similarity], batch of 8.
    B = 8
    ages = jax.random.uniform(k_x, (B, 2), jnp.float32, 18.0, 60.0)
    dist = jax.random.uniform(jax.random.fold_in(k_x, 1), (B, 1), jnp.float32, 0.0, 50.0)
    sim = jax.random.uniform(jax.random.fold_in(k_x, 2), (B, 1), jnp.float32, 0.0, 1.0)
    x = jnp.concatenate([ages, dist, sim], axis=1)                    # (8, 4) f32

    out = swipe_nn_forward(x, params)
    jax.block_until_ready(out)
    ref = reference_forward(x, params)
    assert out.shape == (B, 1)
    assert jnp.allclose(out, ref, atol=2e-5, rtol=1e-4), "f32 mismatch vs reference"

    # Ragged batch with a small tile exercises the multi-step pipelined grid,
    # resident weights, and the implicit (no jnp.pad) tail handling.
    B2 = 300
    x2 = jax.random.uniform(jax.random.fold_in(k_x, 3), (B2, 4), jnp.float32, 0.0, 60.0)
    out2 = swipe_nn_forward(x2, params, tile_b=128)
    jax.block_until_ready(out2)
    ref2 = reference_forward(x2, params)
    assert out2.shape == (B2, 1)
    assert jnp.allclose(out2, ref2, atol=2e-5, rtol=1e-4), "tail mismatch vs reference"

    # bf16 input stream (recommended default on v6e/v7x once HBM-bound); the kernel
    # upcasts to f32 internally, so this also lowers cleanly on v5e.
    out_bf16 = swipe_nn_forward(x2, params, tile_b=128, input_dtype=jnp.bfloat16)
    jax.block_until_ready(out_bf16)
    ref_bf16 = reference_forward(x2.astype(jnp.bfloat16).astype(jnp.float32), params)
    assert jnp.allclose(out_bf16, ref_bf16, atol=1e-4, rtol=1e-3), "bf16 mismatch vs reference"

    print("KERNEL_OK")
</pallas_src>

<mosaic_0001>
module attributes {stable_mosaic.version = 11 : i64} {
  func.func @swipe_nn_kernel(%arg0: i32, %arg1: memref<4x128xf32, #tpu.memory_space<vmem>>, %arg2: memref<32x4xf32, #tpu.memory_space<vmem>>, %arg3: memref<32x1xf32, #tpu.memory_space<vmem>>, %arg4: memref<32x32xf32, #tpu.memory_space<vmem>>, %arg5: memref<32x1xf32, #tpu.memory_space<vmem>>, %arg6: memref<1x32xf32, #tpu.memory_space<vmem>>, %arg7: memref<1x1xf32, #tpu.memory_space<smem>>, %arg8: memref<1x128xf32, #tpu.memory_space<vmem>>) attributes {dimension_semantics = [#tpu.dimension_semantics<parallel>], iteration_bounds = array<i64: 1>, scalar_prefetch = 0 : i64, scratch_operands = 0 : i64, tpu.core_type = #tpu.core_type<tc>, window_params = [{transform_indices = @transform_0, window_bounds = array<i64: 4, 128>}, {pipeline_mode = #tpu.pipeline_mode<synchronous>, transform_indices = @transform_1, window_bounds = array<i64: 32, 4>}, {pipeline_mode = #tpu.pipeline_mode<synchronous>, transform_indices = @transform_2, window_bounds = array<i64: 32, 1>}, {pipeline_mode = #tpu.pipeline_mode<synchronous>, transform_indices = @transform_3, window_bounds = array<i64: 32, 32>}, {pipeline_mode = #tpu.pipeline_mode<synchronous>, transform_indices = @transform_4, window_bounds = array<i64: 32, 1>}, {pipeline_mode = #tpu.pipeline_mode<synchronous>, transform_indices = @transform_5, window_bounds = array<i64: 1, 32>}, {transform_indices = @transform_6, window_bounds = array<i64: 1, 1>}, {transform_indices = @transform_7, window_bounds = array<i64: 1, 128>}]} {
    %c0 = arith.constant 0 : index
    %c0_0 = arith.constant 0 : index
    %0 = vector.load %arg1[%c0, %c0_0] : memref<4x128xf32, #tpu.memory_space<vmem>>, vector<4x128xf32>
    %c0_1 = arith.constant 0 : index
    %c0_2 = arith.constant 0 : index
    %1 = vector.load %arg2[%c0_1, %c0_2] : memref<32x4xf32, #tpu.memory_space<vmem>>, vector<32x4xf32>
    %cst = arith.constant dense<0.000000e+00> : vector<32x128xf32>
    %2 = tpu.matmul %1, %0, %cst {dimension_numbers = #tpu.dot_dimension_numbers<[1], [0], [0], [1], [0, 0, 1, 1], [], []>} : vector<32x4xf32>, vector<4x128xf32>, vector<32x128xf32> -> vector<32x128xf32>
    %c0_3 = arith.constant 0 : index
    %c0_4 = arith.constant 0 : index
    %3 = vector.load %arg3[%c0_3, %c0_4] : memref<32x1xf32, #tpu.memory_space<vmem>>, vector<32x1xf32>
    %4 = vector.broadcast %3 : vector<32x1xf32> to vector<32x128xf32>
    %5 = arith.addf %2, %4 : vector<32x128xf32>
    %cst_5 = arith.constant 0.000000e+00 : f32
    %6 = vector.broadcast %cst_5 : f32 to vector<32x128xf32>
    %7 = arith.maximumf %5, %6 : vector<32x128xf32>
    %c0_6 = arith.constant 0 : index
    %c0_7 = arith.constant 0 : index
    %8 = vector.load %arg4[%c0_6, %c0_7] : memref<32x32xf32, #tpu.memory_space<vmem>>, vector<32x32xf32>
    %cst_8 = arith.constant dense<0.000000e+00> : vector<32x128xf32>
    %9 = tpu.matmul %8, %7, %cst_8 {dimension_numbers = #tpu.dot_dimension_numbers<[1], [0], [0], [1], [0, 0, 1, 1], [], []>} : vector<32x32xf32>, vector<32x128xf32>, vector<32x128xf32> -> vector<32x128xf32>
    %c0_9 = arith.constant 0 : index
    %c0_10 = arith.constant 0 : index
    %10 = vector.load %arg5[%c0_9, %c0_10] : memref<32x1xf32, #tpu.memory_space<vmem>>, vector<32x1xf32>
    %11 = vector.broadcast %10 : vector<32x1xf32> to vector<32x128xf32>
    %12 = arith.addf %9, %11 : vector<32x128xf32>
    %cst_11 = arith.constant 0.000000e+00 : f32
    %13 = vector.broadcast %cst_11 : f32 to vector<32x128xf32>
    %14 = arith.maximumf %12, %13 : vector<32x128xf32>
    %c0_12 = arith.constant 0 : index
    %c0_13 = arith.constant 0 : index
    %15 = vector.load %arg6[%c0_12, %c0_13] : memref<1x32xf32, #tpu.memory_space<vmem>>, vector<1x32xf32>
    %cst_14 = arith.constant dense<0.000000e+00> : vector<1x128xf32>
    %16 = tpu.matmul %15, %14, %cst_14 {dimension_numbers = #tpu.dot_dimension_numbers<[1], [0], [0], [1], [0, 0, 1, 1], [], []>} : vector<1x32xf32>, vector<32x128xf32>, vector<1x128xf32> -> vector<1x128xf32>
    %c0_15 = arith.constant 0 : index
    %c0_16 = arith.constant 0 : index
    %17 = memref.load %arg7[%c0_15, %c0_16] : memref<1x1xf32, #tpu.memory_space<smem>>
    %18 = vector.broadcast %17 : f32 to vector<1x128xf32>
    %19 = arith.addf %16, %18 : vector<1x128xf32>
    %20 = arith.negf %19 : vector<1x128xf32>
    %21 = math.exp %20 : vector<1x128xf32>
    %cst_17 = arith.constant 1.000000e+00 : f32
    %22 = vector.broadcast %cst_17 : f32 to vector<1x128xf32>
    %23 = arith.addf %22, %21 : vector<1x128xf32>
    %24 = arith.divf %22, %23 : vector<1x128xf32>
    %c0_18 = arith.constant 0 : index
    %c0_19 = arith.constant 0 : index
    %25 = vector.load %arg8[%c0_18, %c0_19] : memref<1x128xf32, #tpu.memory_space<vmem>>, vector<1x128xf32>
    tpu.vector_store %arg8[%c0_18, %c0_19], %24 {strides = array<i32>} : memref<1x128xf32, #tpu.memory_space<vmem>>, vector<1x128xf32>,
    return
  }
  func.func @transform_0(%arg0: i32) -> (i32, i32) {
    %c0_i32 = arith.constant 0 : i32
    %c0_i32_0 = arith.constant 0 : i32
    return %c0_i32, %arg0 : i32, i32
  }
  func.func @transform_1(%arg0: i32) -> (i32, i32) {
    %c0_i32 = arith.constant 0 : i32
    %c0_i32_0 = arith.constant 0 : i32
    %c0_i32_1 = arith.constant 0 : i32
    return %c0_i32, %c0_i32_0 : i32, i32
  }
  func.func @transform_2(%arg0: i32) -> (i32, i32) {
    %c0_i32 = arith.constant 0 : i32
    %c0_i32_0 = arith.constant 0 : i32
    %c0_i32_1 = arith.constant 0 : i32
    return %c0_i32, %c0_i32_0 : i32, i32
  }
  func.func @transform_3(%arg0: i32) -> (i32, i32) {
    %c0_i32 = arith.constant 0 : i32
    %c0_i32_0 = arith.constant 0 : i32
    %c0_i32_1 = arith.constant 0 : i32
    return %c0_i32, %c0_i32_0 : i32, i32
  }
  func.func @transform_4(%arg0: i32) -> (i32, i32) {
    %c0_i32 = arith.constant 0 : i32
    %c0_i32_0 = arith.constant 0 : i32
    %c0_i32_1 = arith.constant 0 : i32
    return %c0_i32, %c0_i32_0 : i32, i32
  }
  func.func @transform_5(%arg0: i32) -> (i32, i32) {
    %c0_i32 = arith.constant 0 : i32
    %c0_i32_0 = arith.constant 0 : i32
    %c0_i32_1 = arith.constant 0 : i32
    return %c0_i32, %c0_i32_0 : i32, i32
  }
  func.func @transform_6(%arg0: i32) -> (i32, i32) {
    %c0_i32 = arith.constant 0 : i32
    %c0_i32_0 = arith.constant 0 : i32
    %c0_i32_1 = arith.constant 0 : i32
    return %c0_i32, %c0_i32_0 : i32, i32
  }
  func.func @transform_7(%arg0: i32) -> (i32, i32) {
    %c0_i32 = arith.constant 0 : i32
    %c0_i32_0 = arith.constant 0 : i32
    return %c0_i32, %arg0 : i32, i32
  }
}

</mosaic_0001>

<bundles_post_ra>
// kernel: swipe_nn_forward_t.1
= control target key start
LH: loop header
LB: loop body
LE: loop exit
PB: predicated region body
PF: predicated region fallthrough
CT: control target
= control target key end

     0   :  { %vm70_vm0 = vcmask 1043456   ;;  %vm57_vm1 = vcmask 31744   ;;  %v501_v5 = vmov 0   ;;  %s624_s0 = inlined_call_operand.vmem [shape: f32[4,8], index: 0, kind: input, shape index: {}]   ;;  %s625_s1 = inlined_call_operand.vmem [shape: f32[32,4], index: 1, kind: input, shape index: {}]   ;;  %s626_s2 = inlined_call_operand.vmem [shape: f32[32,1], index: 2, kind: input, shape index: {}]   ;;  %s627_s3 = inlined_call_operand.vmem [shape: f32[32,32], index: 3, kind: input, shape index: {}]   ;;  %s628_s4 = inlined_call_operand.vmem [shape: f32[32,1], index: 4, kind: input, shape index: {}]   ;;  %s629_s5 = inlined_call_operand.vmem [shape: f32[1,32], index: 5, kind: input, shape index: {}]   ;;  %s630_s6 = inlined_call_operand.<no memory space> [shape: f32[1,1], index: 6, kind: input, shape index: {}]   ;;  %s631_s7 = inlined_call_operand.hbm [shape: f32[1,8], index: 7, kind: output, shape index: {}]  }
   0x1   :  { %v28_v0 = vld [vmem:[%s624_s0] sm:$0xf]  ;;  %v30_v2 = vld [vmem:[%s625_s1 + $0x8] sm:$0xff]  ;;  %v31_v3 = vld [vmem:[%s625_s1 + $0x10] sm:$0xff]  ;;  %471 = vset.pattern.permute.xlu0 %v501_v5  ;;  %472 = vset.pattern.permute.xlu1 %v501_v5 }
   0x2   :  { %v29_v1 = vld [vmem:[%s625_s1] sm:$0xff]  ;;  %419 = vmatprep.subr.msk.mxu0 %vm70_vm0, %v28_v0  ;;  %v35_v6 = vld [vmem:[%s626_s2 + $0x10] sm:$0xff]  ;;  %v32_v7 = vld [vmem:[%s625_s1 + $0x18] sm:$0xff] }
   0x3   :  { %421 = vmatprep.mubr.msk.f32.mxu0 %vm57_vm1, %v29_v1  ;;  %v33_v4 = vld [vmem:[%s626_s2] sm:$0xff]  ;;  %420 = vmatpush3.msk.msra.mxu0 %vm70_vm0, %v28_v0  ;;  %v34_v8 = vld [vmem:[%s626_s2 + $0x8] sm:$0xff] }
   0x4   :  { %422 = vmatmul.mubr.msk.f32.vlgmr.msra.gmra.mrb[0].mxu0 %vm57_vm1, %v30_v2  ;;  %39 = vperm.xlu0 %471, %v33_v4  }
   0x5   :  { %424 = vmatprep.mubr.msk.f32.mxu0 %vm57_vm1, %v31_v3 }
   0x6   :  { %13 = vsyncpa [#allocation4], 0  ;;  %49 = vperm.xlu1 %472, %v35_v6   ;;  %v36_v9 = vld [vmem:[%s626_s2 + $0x18] sm:$0xff]  ;;  %v167_v10 = vld [vmem:[%s628_s4] sm:$0xff]  ;;  %vm191_vm2 = vcmask 261120   ;;  %v502_v36 = vmov 0.0|0.0   ;;  %v295_v57 = vstv %s630_s6 }
   0x7   :  { %v168_v11 = vld [vmem:[%s628_s4 + $0x8] sm:$0xff]  ;;  %v169_v12 = vld [vmem:[%s628_s4 + $0x10] sm:$0xff]  ;;  %v170_v13 = vld [vmem:[%s628_s4 + $0x18] sm:$0xff]  ;;  %460 = vmatprep.subr.bf16.mxu0 %v502_v36  ;;  %vm503_vm3 = vmmov 0   ;;  %v504_v37 = vmov 0.0   ;;  %s505_s0 = smov [#allocation3]  }
   0x8   :  { %425 = vmatmul.mubr.msk.f32.gmra.mrb[2].mxu0 %vm57_vm1, %v32_v7  ;;  %44 = vperm.xlu0 %471, %v34_v8   ;;  %v163_v14 = vld [vmem:[%s627_s3] sm:$0xff]  ;;  %v164_v33 = vld [vmem:[%s627_s3 + $0x8] sm:$0xff]  ;;  %v165_v34 = vld [vmem:[%s627_s3 + $0x10] sm:$0xff]  ;;  %s382_s11 = sshll.u32 %s505_s0, 4  ;;  %s383_s11 = int_to_ptr.vmem [resolvable:$true] %s382_s11 }
   0x9   :  { %435 = vmatprep.mubr.msk.f32.mxu1 %vm191_vm2, %v163_v14  ;;  %v166_v35 = vld [vmem:[%s627_s3 + $0x18] sm:$0xff]  ;;  %449 = vmatprep.mubr.msk.f32.mxu0 %vm503_vm3, %v504_v37  ;;  %v293_v56 = vld [vmem:[%s629_s5] sm:$0x1]  ;;  %s477_s5 = scalar_lea.vmem %s383_s11, 16  ;;  %s481_s12 = scalar_lea.vmem %s383_s11, 32 }
   0xa   :  { %54 = vperm.xlu1 %472, %v36_v9   ;;  %p478_p0 = scmp.ne.s32.totalorder %s383_s11, %s477_s5  ;;  %p482_p1 = scmp.lt.s32.totalorder %s383_s11, %s383_s11 }
   0xb   :  { %p483_p2 = scmp.lt.s32.totalorder %s481_s12, %s477_s5 }
   0xc   :  { %173 = vperm.xlu0 %471, %v167_v10  }
   0xd   :  { %p484_p3 = por %p483_p2, %p482_p1 }
   0xe   :  { %178 = vperm.xlu1 %472, %v168_v11  }
   0xf   :  { %p485_p4 = pnand %p484_p3, %p478_p0 }
  0x10   :  { %183 = vperm.xlu0 %471, %v169_v12  }
  0x12   :  { %188 = vperm.xlu1 %472, %v170_v13  }
  0x83   :  { %v40_v15 = vpop.permute.xlu0 %39 }
  0x85   :  { %v50_v16 = vpop.permute.xlu1 %49 }
  0x87   :  { %v45_v17 = vpop.permute.xlu0 %44 }
  0x89   :  { %v55_v23 = vpop.permute.xlu1 %54 }
  0x8b   :  { %v174_v39 = vpop.permute.xlu0 %173 }
  0x8d   :  { %v179_v38 = vpop.permute.xlu1 %178 }
  0x8f   :  { %v184_v48 = vpop.permute.xlu0 %183 }
  0x91   :  { %v189_v45 = vpop.permute.xlu1 %188 }
  0xd7   :  { %v423_v18 = vpop.f32.mrb[0].mxu0 }
  0xd8   :  { %v146_v19 = vadd.f32 %v423_v18, %v45_v17  ;;  %v140_v20 = vpop.f32.mrb[1].mxu0 }
  0xd9   :  { %v141_v21 = vadd.f32 %v140_v20, %v40_v15 }
  0xda   :  { %v160_v22 = vmax.f32 %v146_v19, 0.0 }
  0xdb   :  { %v159_v24 = vmax.f32 %v141_v21, 0.0  ;;  %v426_v25 = vpop.f32.mrb[2].mxu0 }
  0xdc   :  { %v156_v26 = vadd.f32 %v426_v25, %v55_v23  ;;  %v150_v27 = vpop.f32.mrb[3].mxu0 }
  0xdd   :  { %v151_v28 = vadd.f32 %v150_v27, %v50_v16  ;;  %v452_v29 = vpack.c.bf16 %v160_v22, %v159_v24 }
  0xde   :  { %v162_v30 = vmax.f32 %v156_v26, 0.0 }
  0xdf   :  { %v161_v31 = vmax.f32 %v151_v28, 0.0  ;;  %453 = vmatprep.subr.bf16.mxu1 %v452_v29 }
  0xe0   :  { %455 = vmatpush3.bf16.msra.mxu1 %v452_v29 }
  0xe1   :  { %v456_v32 = vpack.c.bf16 %v162_v30, %v161_v31 }
  0xe3   :  { %457 = vmatprep.subr.bf16.mxu1 %v456_v32 }
  0xe4   :  { %459 = vmatpush3.bf16.msra.mxu1 %v456_v32 }
  0xe7   :  { %436 = vmatmul.mubr.msk.f32.vlgmr.msra.gmra.mrb[0].mxu1 %vm191_vm2, %v164_v33 }
  0xe8   :  { %438 = vmatprep.mubr.msk.f32.mxu1 %vm191_vm2, %v165_v34 }
  0xeb   :  { %439 = vmatmul.mubr.msk.f32.gmra.mrb[2].mxu1 %vm191_vm2, %v166_v35 }
 0x1ba   :  { %v437_v40 = vpop.f32.mrb[0].mxu1 }
 0x1bb   :  { %v276_v41 = vadd.f32 %v437_v40, %v179_v38  ;;  %v270_v42 = vpop.f32.mrb[1].mxu1 }
 0x1bc   :  { %v271_v43 = vadd.f32 %v270_v42, %v174_v39 }
 0x1bd   :  { %v290_v44 = vmax.f32 %v276_v41, 0.0 }
 0x1be   :  { %v289_v46 = vmax.f32 %v271_v43, 0.0  ;;  %v440_v47 = vpop.f32.mrb[2].mxu1 }
 0x1bf   :  { %v286_v49 = vadd.f32 %v440_v47, %v189_v45  ;;  %v280_v50 = vpop.f32.mrb[3].mxu1 }
 0x1c0   :  { %v461_v51 = vpack.c.bf16 %v290_v44, %v289_v46  ;;  %v281_v52 = vadd.f32 %v280_v50, %v184_v48 }
 0x1c1   :  { %v292_v53 = vmax.f32 %v286_v49, 0.0 }
 0x1c2   :  { %v291_v54 = vmax.f32 %v281_v52, 0.0  ;;  %462 = vmatpush3.bf16.msra.mxu0 %v461_v51 }
 0x1c3   :  { %463 = vmatprep.subr.bf16.mxu0 %v502_v36 }
 0x1c4   :  { %v464_v55 = vpack.c.bf16 %v292_v53, %v291_v54 }
 0x1c6   :  { %465 = vmatpush3.bf16.msra.mxu0 %v464_v55 }
 0x1c9   :  { %450 = vmatmul.mubr.msk.f32.vlgmr.msra.gmra.mrb[4].mxu0 %vm191_vm2, %v293_v56 }
 0x29c   :  { %v365_v58 = vpop.f32.mrb[4].mxu0 }
 0x29d   :  { %v366_v59 = vadd.f32 %v365_v58, %v295_v57  ;;  %v451_v60 = vpop.f32.mrb[5].mxu0 }
 0x29f   :  { %v400_v61 = vmul.f32 -1.442695, %v366_v59 }
 0x2a1   :  { %473 = vpow2.f32 %v400_v61 }
 0x2ab   :  { %v474_v62 = vpop.eup %473 }
 0x2ac   :  { %v372_v63 = vadd.f32 1.0, %v474_v62 }
 0x2ae   :  { %475 = vrcp.f32 %v372_v63 }
 0x2b8   :  { %v476_v0 = vpop.eup %475 }
 0x2b9   :  { %375 = vst [vmem:[#allocation3] sm:$0x1] %v476_v0 }
 0x2ba   :  { %488 = shalt.err (!%p485_p4)
}
 0x2bb   :  { %s489_s14 = scalar_lea.hbm %s631_s7, 16 }
 0x2bc   :  { %p490_p5 = scmp.ne.s32.totalorder %s631_s7, %s489_s14  ;;  %p493_p6 = scmp.lt.u32.totalorder %s489_s14, %s631_s7 }
 0x2be   :  { %p495_p7 = pnand %p493_p6, %p490_p5 }
 0x2c0   :  { %498 = shalt.err (!%p495_p7)
}
 0x2c1   :  { %385 = dma.vmem_to_hbm [thread:$0]  %s383_s11, 16, %s631_s7, [#allocation4]  }
 0x2c2   :  { %499 = dma.done.wait [#allocation4], 16  }
 0x2c3   :  { %500 = vsyncadd [#allocation4], 4294967280 }
 0x2c4   :  { %389 = vsyncpa [#allocation4], 1 }

</bundles_post_ra>
